<compile_context>
chip_gen: v7x
topology: tpu7x:2x2x1
jax: 0.10.0
libtpu: 0.0.40
codegen_flags: <defaults>
</compile_context>

<pallas_src>
import functools
import math

import jax
import jax.numpy as jnp
from jax import lax
from jax.experimental import pallas as pl
from jax.experimental.pallas import tpu as pltpu

EPS = 1e-5          # nn.InstanceNorm2d default eps
BF16 = jnp.bfloat16
F32 = jnp.float32


def _bilateral_kernel(scale, inv_hw, m,
                      vis_ref, lan_ref,
                      vw_ref, vaff_ref,
                      twq_ref, tbq_ref, twk_ref, tbk_ref, twv_ref, tbv_ref,
                      ovw_ref, ovaff_ref, otw_ref, otb_ref,
                      vis_out_ref, lan_out_ref):
    """One batch element per grid step.  Vision path stays channels-first with
    HW on the lane axis, so all big tiles are lane-dense and never transposed."""

    def inorm(y, gamma, beta):
        # One-pass InstanceNorm stats (var = E[y^2] - E[y]^2; slightly less
        # stable than the two-pass form but fine for normalized activations),
        # then a single fused scale/shift over the big tile: y*a + b.
        mu = jnp.sum(y, axis=1, keepdims=True) * inv_hw
        ms = jnp.sum(y * y, axis=1, keepdims=True) * inv_hw
        a = lax.rsqrt(ms - mu * mu + EPS) * gamma
        b = beta - mu * a
        return y * a + b

    vis = vis_ref[0]                     # (C, HW)  bf16 (cast once in wrapper)
    lan = lan_ref[0]                     # (N, Ci)  f32
    lan_b = lan.astype(BF16)

    # ---- fused v_proj1/2/3: one (3M, C) @ (C, HW) MXU op --------------------
    # Pre-norm conv biases are dropped (InstanceNorm mean-subtracts them away).
    # TODO(synk): pad M to a multiple of 8 (ideally 128) so the qv/kv/vv row
    # slices stay tile-aligned at production sizes.
    pv = jnp.dot(vw_ref[...], vis, preferred_element_type=F32)        # (3M, HW)
    pv = jnp.maximum(inorm(pv, vaff_ref[0], vaff_ref[1]), 0.0)
    qv = pv[0 * m:1 * m].astype(BF16)                                  # (M, HW)
    kv = pv[1 * m:2 * m].astype(BF16)                                  # (M, HW)
    vv = pv[2 * m:3 * m].astype(BF16)                                  # (M, HW)

    # ---- t_proj1/2/3 (tiny).  Q/K are separate dots so no lane-axis slice of
    # a fused (N, 2M) tile is ever needed at non-128-multiple M. --------------
    qt = jnp.maximum(jnp.dot(lan_b, twq_ref[...],
                             preferred_element_type=F32) + tbq_ref[...], 0.0)
    kt = jnp.maximum(jnp.dot(lan_b, twk_ref[...],
                             preferred_element_type=F32) + tbk_ref[...], 0.0)
    qt = (qt * scale).astype(BF16)       # 1/sqrt(Ci) folded into small operands
    kt = (kt * scale).astype(BF16)

    # Vt produced directly channels-first (M, N): tiny bf16 NT dot, so no
    # in-kernel transpose of the language activations is ever needed.
    vt = lax.dot_general(twv_ref[...], lan_b, (((1,), (1,)), ((), ())),
                         preferred_element_type=F32) + tbv_ref[...]
    vt = jnp.maximum(vt, 0.0).astype(BF16)                             # (M, N)

    # ---- Av^T = softmax_N(Kt . Qv)  ->  (N, HW) ------------------------------
    sv = jnp.dot(kt, qv, preferred_element_type=F32)                   # (N, HW)
    ev = jnp.exp(sv - jnp.max(sv, axis=0, keepdims=True))
    # approx EUP reciprocal: ~1e-3 relative error in the softmax denominator;
    # fine for inference, switch to an exact divide for training-grade runs.
    av = ev * pl.reciprocal(jnp.sum(ev, axis=0, keepdims=True), approx=True)

    # new_vis channels-first: (M, HW) = Vt . Av^T = (Av Vt)^T
    new_vis = jnp.dot(vt, av.astype(BF16), preferred_element_type=F32)

    # ---- v_output hoisted here so new_vis / yv go dead before the second
    # attention branch (lower peak VMEM / vreg pressure) -----------------------
    yv = jnp.dot(ovw_ref[...], new_vis.astype(BF16),
                 preferred_element_type=F32)                           # (C, HW)
    vis_out_ref[0] = inorm(yv, ovaff_ref[0], ovaff_ref[1])

    # ---- At = softmax_HW(Qt . Kv)  ->  (N, HW) -------------------------------
    st = jnp.dot(qt, kv, preferred_element_type=F32)                   # (N, HW)
    et = jnp.exp(st - jnp.max(st, axis=-1, keepdims=True))
    at = et * pl.reciprocal(jnp.sum(et, axis=-1, keepdims=True), approx=True)

    # new_lan^T: (M, N) = Vv . At^T.  bf16 NT dot with f32 accumulation -- HW
    # is the large contraction dim here, so avoiding the emulated f32 MXU path
    # matters; only the small (N, HW) operand is internally transposed.
    new_lan = lax.dot_general(vv, at.astype(BF16), (((1,), (1,)), ((), ())),
                              preferred_element_type=F32)              # (M, N)

    # ---- t_output: Linear, emitted as (Ci, N); wrapper transposes (tiny) -----
    lan_out_ref[0] = jnp.dot(otw_ref[...], new_lan.astype(BF16),
                             preferred_element_type=F32) + otb_ref[...]


def init_params(key, vis_chans, lan_chans, m_chans=None):
    if m_chans is None:
        m_chans = vis_chans
    ks = jax.random.split(key, 8)
    s = 1.0
    return dict(
        # 3 stacked v_proj branches: conv1x1 weight stored as (in, out)
        vw=jax.random.normal(ks[0], (3, vis_chans, m_chans), F32) * s,
        vb=jax.random.normal(ks[1], (3, 1, m_chans), F32) * s,
        vg=jnp.ones((3, 1, m_chans), F32),       # InstanceNorm gamma (init 1)
        vbe=jnp.zeros((3, 1, m_chans), F32),     # InstanceNorm beta  (init 0)
        # 3 stacked t_proj branches: Linear weight stored as (in, out)
        tw=jax.random.normal(ks[2], (3, lan_chans, m_chans), F32) * s,
        tb=jax.random.normal(ks[3], (3, 1, m_chans), F32) * s,
        # v_output
        ovw=jax.random.normal(ks[4], (m_chans, vis_chans), F32) * s,
        ovb=jax.random.normal(ks[5], (1, vis_chans), F32) * s,
        ovg=jnp.ones((1, vis_chans), F32),
        ovbe=jnp.zeros((1, vis_chans), F32),
        # t_output
        otw=jax.random.normal(ks[6], (m_chans, lan_chans), F32) * s,
        otb=jax.random.normal(ks[7], (1, lan_chans), F32) * s,
    )


def bilateral_prompt_forward(vis, lan, params):
    """vis: (B, C, H, W), lan: (B, lan_chans, N) -> ((B, C, H, W), (B, N, lan_chans))."""
    B, C, H, W = vis.shape
    HW = H * W
    _, Ci, N = lan.shape
    M = params["vw"].shape[-1]
    assert params["tw"].shape[-1] == M and Ci == M, \
        "module semantics require lan_chans == m_chans"
    scale = 1.0 / math.sqrt(Ci)

    # ---- pack / fuse weights (tiny, layout-only, one-time) -------------------
    v_w = jnp.transpose(params["vw"], (0, 2, 1)).reshape(3 * M, C).astype(BF16)
    # InstanceNorm affine only (pre-norm conv biases are mathematically no-ops)
    v_aff = jnp.stack([params["vg"].reshape(3 * M, 1),
                       params["vbe"].reshape(3 * M, 1)])                  # (2, 3M, 1)
    t_wq = params["tw"][0].astype(BF16)                                   # (Ci, M)
    t_bq = params["tb"][0]                                                # (1, M)
    t_wk = params["tw"][1].astype(BF16)                                   # (Ci, M)
    t_bk = params["tb"][1]                                                # (1, M)
    t_wv = jnp.transpose(params["tw"][2]).astype(BF16)                    # (M, Ci)
    t_bv = params["tb"][2].reshape(M, 1)                                  # (M, 1)
    ov_w = jnp.transpose(params["ovw"]).astype(BF16)                      # (C, M)
    ov_aff = jnp.stack([params["ovg"].reshape(C, 1),
                        params["ovbe"].reshape(C, 1)])                    # (2, C, 1)
    ot_w = jnp.transpose(params["otw"]).astype(BF16)                      # (Ci, M)
    ot_b = params["otb"].reshape(Ci, 1)                                   # (Ci, 1)
    weights = [v_w, v_aff, t_wq, t_bq, t_wk, t_bk, t_wv, t_bv,
               ov_w, ov_aff, ot_w, ot_b]

    # Vision tensor enters the kernel channels-first with HW on the lane axis
    # and already in bf16: only a free reshape + one cast, half the DMA bytes.
    vis_cf = vis.reshape(B, C, HW).astype(BF16)
    lan_rows = jnp.transpose(lan, (0, 2, 1))        # tiny (B, N, Ci)

    def const_spec(x):
        nd = x.ndim
        return pl.BlockSpec(x.shape, lambda b, _nd=nd: (0,) * _nd)

    in_specs = ([pl.BlockSpec((1, C, HW), lambda b: (b, 0, 0)),
                 pl.BlockSpec((1, N, Ci), lambda b: (b, 0, 0))]
                + [const_spec(w) for w in weights])
    out_specs = [pl.BlockSpec((1, C, HW), lambda b: (b, 0, 0)),
                 pl.BlockSpec((1, Ci, N), lambda b: (b, 0, 0))]
    out_shape = (jax.ShapeDtypeStruct((B, C, HW), F32),
                 jax.ShapeDtypeStruct((B, Ci, N), F32))

    # VMEM budget: estimate the per-step working set and never request the
    # whole physical VMEM (leave ~12.5% headroom for Mosaic scratch/semaphores).
    io_bytes = 2 * (C * HW * 2 + N * Ci * 4 + C * HW * 4 + Ci * N * 4)
    w_bytes = 2 * sum(int(w.size) * w.dtype.itemsize for w in weights)
    inter_bytes = HW * (3 * M * 4 + 3 * M * 2 + M * 4 + C * 4 + 2 * N * 4)
    est = io_bytes + w_bytes + inter_bytes + (4 << 20)
    try:
        phys = getattr(pltpu.get_tpu_info(), "vmem_capacity_bytes",
                       64 * 1024 * 1024)
    except Exception:  # older jax / query unavailable: assume the smallest gen
        phys = 64 * 1024 * 1024
    vmem_limit = int(min(max(est, 32 << 20), phys - phys // 8))

    # TODO(synk): for production HW/M on v7x (64 MiB VMEM) add an HW-tile grid
    # axis with an online (flash-style) softmax for the At branch and
    # accumulated InstanceNorm sum/sumsq stats; at these sizes one batch
    # element per grid step fits.  Weight blocks could additionally use
    # pipeline_mode=pl.Buffered(1) to halve their footprint; kept at the
    # default here for cross-version portability.
    vis_out, lan_out_cf = pl.pallas_call(
        functools.partial(_bilateral_kernel, scale, 1.0 / HW, M),
        grid=(B,),
        in_specs=in_specs,
        out_specs=out_specs,
        out_shape=out_shape,
        compiler_params=pltpu.CompilerParams(
            dimension_semantics=("parallel",),
            vmem_limit_bytes=vmem_limit),
    )(vis_cf, lan_rows, *weights)

    new_vis = vis_out.reshape(B, C, H, W)            # free reshape
    new_lan = jnp.transpose(lan_out_cf, (0, 2, 1))   # tiny (B, N, Ci)
    return new_vis, new_lan


def reference_forward(vis, lan, params):
    """Plain-JAX mirror of the PyTorch forward with the same mixed precision
    as the Pallas kernel (bf16 matmul operands, f32 accumulation/elementwise),
    used as the correctness check.  Keeps the pre-norm conv biases and the
    two-pass InstanceNorm, which the kernel legally elides/refactors."""
    B, C, H, W = vis.shape
    HW = H * W
    lan_t = jnp.transpose(lan, (0, 2, 1))                     # (B, N, Ci)
    Ci = lan_t.shape[-1]
    scale = 1.0 / math.sqrt(Ci)
    vis_r = jnp.transpose(vis.reshape(B, C, HW), (0, 2, 1))   # (B, HW, C)

    def inorm(y, g, b):
        mu = y.mean(axis=1, keepdims=True)
        var = ((y - mu) ** 2).mean(axis=1, keepdims=True)
        return (y - mu) * lax.rsqrt(var + EPS) * g + b

    def vproj(i):
        y = jnp.einsum("bsc,cm->bsm", vis_r.astype(BF16),
                       params["vw"][i].astype(BF16),
                       preferred_element_type=F32) + params["vb"][i]
        return jnp.maximum(inorm(y, params["vg"][i], params["vbe"][i]), 0.0)

    def tproj(i):
        y = jnp.einsum("bnc,cm->bnm", lan_t.astype(BF16),
                       params["tw"][i].astype(BF16),
                       preferred_element_type=F32) + params["tb"][i]
        return jnp.maximum(y, 0.0)

    Qv, Kv, Vv = vproj(0), vproj(1), vproj(2)              # (B, HW, M) f32
    Qt, Kt, Vt = tproj(0), tproj(1), tproj(2)              # (B, N, M)  f32

    Av = jax.nn.softmax(
        jnp.einsum("bsm,bnm->bsn", Qv.astype(BF16), (Kt * scale).astype(BF16),
                   preferred_element_type=F32), axis=-1)
    At = jax.nn.softmax(
        jnp.einsum("bnm,bsm->bns", (Qt * scale).astype(BF16), Kv.astype(BF16),
                   preferred_element_type=F32), axis=-1)
    new_vis = jnp.einsum("bsn,bnm->bsm", Av.astype(BF16), Vt.astype(BF16),
                         preferred_element_type=F32)
    new_lan = jnp.einsum("bns,bsm->bnm", At.astype(BF16), Vv.astype(BF16),
                         preferred_element_type=F32)

    y = jnp.einsum("bsm,mc->bsc", new_vis.astype(BF16),
                   params["ovw"].astype(BF16),
                   preferred_element_type=F32) + params["ovb"]
    y = inorm(y, params["ovg"], params["ovbe"])
    vis_out = jnp.transpose(y, (0, 2, 1)).reshape(B, C, H, W)
    lan_out = jnp.einsum("bnm,mc->bnc", new_lan.astype(BF16),
                         params["otw"].astype(BF16),
                         preferred_element_type=F32) + params["otb"]
    return vis_out, lan_out


if __name__ == "__main__":
    key = jax.random.PRNGKey(0)
    k_vis, k_lan, k_par = jax.random.split(key, 3)

    B, C, H, W, N = 2, 4, 16, 16, 8          # vis_chans = lan_chans = m_chans = 4
    vis = jax.random.normal(k_vis, (B, C, H, W), F32)
    lan = jax.random.normal(k_lan, (B, C, N), F32)       # (B, lan_chans, N)
    params = init_params(k_par, vis_chans=C, lan_chans=C)

    out_vis, out_lan = bilateral_prompt_forward(vis, lan, params)
    jax.block_until_ready((out_vis, out_lan))

    ref_vis, ref_lan = reference_forward(vis, lan, params)
    assert out_vis.shape == (B, C, H, W) and out_lan.shape == (B, N, C)
    assert jnp.allclose(out_vis, ref_vis, atol=5e-2, rtol=5e-2), \
        float(jnp.max(jnp.abs(out_vis - ref_vis)))
    assert jnp.allclose(out_lan, ref_lan, atol=5e-2, rtol=5e-2), \
        float(jnp.max(jnp.abs(out_lan - ref_lan)))

    print("KERNEL_OK")
</pallas_src>

<mosaic_0001>
module attributes {stable_mosaic.version = 11 : i64} {
  func.func @_bilateral_kernel(%arg0: i32, %arg1: memref<1x4x256xbf16, #tpu.memory_space<vmem>>, %arg2: memref<1x8x4xf32, #tpu.memory_space<vmem>>, %arg3: memref<12x4xbf16, #tpu.memory_space<vmem>>, %arg4: memref<2x12x1xf32, #tpu.memory_space<vmem>>, %arg5: memref<4x4xbf16, #tpu.memory_space<vmem>>, %arg6: memref<1x4xf32, #tpu.memory_space<vmem>>, %arg7: memref<4x4xbf16, #tpu.memory_space<vmem>>, %arg8: memref<1x4xf32, #tpu.memory_space<vmem>>, %arg9: memref<4x4xbf16, #tpu.memory_space<vmem>>, %arg10: memref<4x1xf32, #tpu.memory_space<vmem>>, %arg11: memref<4x4xbf16, #tpu.memory_space<vmem>>, %arg12: memref<2x4x1xf32, #tpu.memory_space<vmem>>, %arg13: memref<4x4xbf16, #tpu.memory_space<vmem>>, %arg14: memref<4x1xf32, #tpu.memory_space<vmem>>, %arg15: memref<1x4x256xf32, #tpu.memory_space<vmem>>, %arg16: memref<1x4x8xf32, #tpu.memory_space<vmem>>) attributes {dimension_semantics = [#tpu.dimension_semantics<parallel>], iteration_bounds = array<i64: 2>, scalar_prefetch = 0 : i64, scratch_operands = 0 : i64, tpu.core_type = #tpu.core_type<tc>, window_params = [{transform_indices = @transform_0, window_bounds = array<i64: 1, 4, 256>}, {transform_indices = @transform_1, window_bounds = array<i64: 1, 8, 4>}, {pipeline_mode = #tpu.pipeline_mode<synchronous>, transform_indices = @transform_2, window_bounds = array<i64: 12, 4>}, {pipeline_mode = #tpu.pipeline_mode<synchronous>, transform_indices = @transform_3, window_bounds = array<i64: 2, 12, 1>}, {pipeline_mode = #tpu.pipeline_mode<synchronous>, transform_indices = @transform_4, window_bounds = array<i64: 4, 4>}, {pipeline_mode = #tpu.pipeline_mode<synchronous>, transform_indices = @transform_5, window_bounds = array<i64: 1, 4>}, {pipeline_mode = #tpu.pipeline_mode<synchronous>, transform_indices = @transform_6, window_bounds = array<i64: 4, 4>}, {pipeline_mode = #tpu.pipeline_mode<synchronous>, transform_indices = @transform_7, window_bounds = array<i64: 1, 4>}, {pipeline_mode = #tpu.pipeline_mode<synchronous>, transform_indices = @transform_8, window_bounds = array<i64: 4, 4>}, {pipeline_mode = #tpu.pipeline_mode<synchronous>, transform_indices = @transform_9, window_bounds = array<i64: 4, 1>}, {pipeline_mode = #tpu.pipeline_mode<synchronous>, transform_indices = @transform_10, window_bounds = array<i64: 4, 4>}, {pipeline_mode = #tpu.pipeline_mode<synchronous>, transform_indices = @transform_11, window_bounds = array<i64: 2, 4, 1>}, {pipeline_mode = #tpu.pipeline_mode<synchronous>, transform_indices = @transform_12, window_bounds = array<i64: 4, 4>}, {pipeline_mode = #tpu.pipeline_mode<synchronous>, transform_indices = @transform_13, window_bounds = array<i64: 4, 1>}, {transform_indices = @transform_14, window_bounds = array<i64: 1, 4, 256>}, {transform_indices = @transform_15, window_bounds = array<i64: 1, 4, 8>}]} {
    %c0 = arith.constant 0 : index
    %c0_0 = arith.constant 0 : index
    %c0_1 = arith.constant 0 : index
    %0 = vector.load %arg1[%c0, %c0_0, %c0_1] : memref<1x4x256xbf16, #tpu.memory_space<vmem>>, vector<1x4x256xbf16>
    %1 = vector.shape_cast %0 : vector<1x4x256xbf16> to vector<4x256xbf16>
    %c0_2 = arith.constant 0 : index
    %c0_3 = arith.constant 0 : index
    %c0_4 = arith.constant 0 : index
    %2 = vector.load %arg2[%c0_2, %c0_3, %c0_4] : memref<1x8x4xf32, #tpu.memory_space<vmem>>, vector<1x8x4xf32>
    %3 = vector.shape_cast %2 : vector<1x8x4xf32> to vector<8x4xf32>
    %4 = arith.truncf %3 : vector<8x4xf32> to vector<8x4xbf16>
    %c0_5 = arith.constant 0 : index
    %c0_6 = arith.constant 0 : index
    %5 = vector.load %arg3[%c0_5, %c0_6] : memref<12x4xbf16, #tpu.memory_space<vmem>>, vector<12x4xbf16>
    %cst = arith.constant dense<0.000000e+00> : vector<12x256xf32>
    %6 = tpu.matmul %5, %1, %cst {dimension_numbers = #tpu.dot_dimension_numbers<[1], [0], [0], [1], [0, 0, 1, 1], [], []>} : vector<12x4xbf16>, vector<4x256xbf16>, vector<12x256xf32> -> vector<12x256xf32>
    %c0_7 = arith.constant 0 : index
    %c0_8 = arith.constant 0 : index
    %c0_9 = arith.constant 0 : index
    %7 = vector.load %arg4[%c0_7, %c0_8, %c0_9] : memref<2x12x1xf32, #tpu.memory_space<vmem>>, vector<1x12x1xf32>
    %8 = vector.shape_cast %7 : vector<1x12x1xf32> to vector<12x1xf32>
    %c1 = arith.constant 1 : index
    %c0_10 = arith.constant 0 : index
    %c0_11 = arith.constant 0 : index
    %9 = vector.load %arg4[%c1, %c0_10, %c0_11] : memref<2x12x1xf32, #tpu.memory_space<vmem>>, vector<1x12x1xf32>
    %10 = vector.shape_cast %9 : vector<1x12x1xf32> to vector<12x1xf32>
    %cst_12 = arith.constant dense<0.000000e+00> : vector<12xf32>
    %11 = vector.multi_reduction <add>, %6, %cst_12 [1] : vector<12x256xf32> to vector<12xf32>
    %12 = vector.shape_cast %11 : vector<12xf32> to vector<12x1xf32>
    %cst_13 = arith.constant 3.906250e-03 : f32
    %13 = vector.broadcast %cst_13 : f32 to vector<12x1xf32>
    %14 = arith.mulf %12, %13 : vector<12x1xf32>
    %15 = arith.mulf %6, %6 : vector<12x256xf32>
    %cst_14 = arith.constant dense<0.000000e+00> : vector<12xf32>
    %16 = vector.multi_reduction <add>, %15, %cst_14 [1] : vector<12x256xf32> to vector<12xf32>
    %17 = vector.shape_cast %16 : vector<12xf32> to vector<12x1xf32>
    %cst_15 = arith.constant 3.906250e-03 : f32
    %18 = vector.broadcast %cst_15 : f32 to vector<12x1xf32>
    %19 = arith.mulf %17, %18 : vector<12x1xf32>
    %20 = arith.mulf %14, %14 : vector<12x1xf32>
    %21 = arith.subf %19, %20 : vector<12x1xf32>
    %cst_16 = arith.constant 9.99999974E-6 : f32
    %22 = vector.broadcast %cst_16 : f32 to vector<12x1xf32>
    %23 = arith.addf %21, %22 : vector<12x1xf32>
    %24 = math.rsqrt %23 : vector<12x1xf32>
    %25 = arith.mulf %24, %8 : vector<12x1xf32>
    %26 = arith.mulf %14, %25 : vector<12x1xf32>
    %27 = arith.subf %10, %26 : vector<12x1xf32>
    %28 = vector.broadcast %25 : vector<12x1xf32> to vector<12x256xf32>
    %29 = arith.mulf %6, %28 : vector<12x256xf32>
    %30 = vector.broadcast %27 : vector<12x1xf32> to vector<12x256xf32>
    %31 = arith.addf %29, %30 : vector<12x256xf32>
    %cst_17 = arith.constant 0.000000e+00 : f32
    %32 = vector.broadcast %cst_17 : f32 to vector<12x256xf32>
    %33 = arith.maximumf %31, %32 : vector<12x256xf32>
    %34 = vector.extract_strided_slice %33 {offsets = [0, 0], sizes = [4, 256], strides = [1, 1]} : vector<12x256xf32> to vector<4x256xf32>
    %35 = arith.truncf %34 : vector<4x256xf32> to vector<4x256xbf16>
    %36 = vector.extract_strided_slice %33 {offsets = [4, 0], sizes = [4, 256], strides = [1, 1]} : vector<12x256xf32> to vector<4x256xf32>
    %37 = arith.truncf %36 : vector<4x256xf32> to vector<4x256xbf16>
    %38 = vector.extract_strided_slice %33 {offsets = [8, 0], sizes = [4, 256], strides = [1, 1]} : vector<12x256xf32> to vector<4x256xf32>
    %39 = arith.truncf %38 : vector<4x256xf32> to vector<4x256xbf16>
    %c0_18 = arith.constant 0 : index
    %c0_19 = arith.constant 0 : index
    %40 = vector.load %arg5[%c0_18, %c0_19] : memref<4x4xbf16, #tpu.memory_space<vmem>>, vector<4x4xbf16>
    %cst_20 = arith.constant dense<0.000000e+00> : vector<8x4xf32>
    %41 = tpu.matmul %4, %40, %cst_20 {dimension_numbers = #tpu.dot_dimension_numbers<[1], [0], [0], [1], [0, 0, 1, 1], [], []>} : vector<8x4xbf16>, vector<4x4xbf16>, vector<8x4xf32> -> vector<8x4xf32>
    %c0_21 = arith.constant 0 : index
    %c0_22 = arith.constant 0 : index
    %42 = vector.load %arg6[%c0_21, %c0_22] : memref<1x4xf32, #tpu.memory_space<vmem>>, vector<1x4xf32>
    %43 = vector.broadcast %42 : vector<1x4xf32> to vector<8x4xf32>
    %44 = arith.addf %41, %43 : vector<8x4xf32>
    %cst_23 = arith.constant 0.000000e+00 : f32
    %45 = vector.broadcast %cst_23 : f32 to vector<8x4xf32>
    %46 = arith.maximumf %44, %45 : vector<8x4xf32>
    %c0_24 = arith.constant 0 : index
    %c0_25 = arith.constant 0 : index
    %47 = vector.load %arg7[%c0_24, %c0_25] : memref<4x4xbf16, #tpu.memory_space<vmem>>, vector<4x4xbf16>
    %cst_26 = arith.constant dense<0.000000e+00> : vector<8x4xf32>
    %48 = tpu.matmul %4, %47, %cst_26 {dimension_numbers = #tpu.dot_dimension_numbers<[1], [0], [0], [1], [0, 0, 1, 1], [], []>} : vector<8x4xbf16>, vector<4x4xbf16>, vector<8x4xf32> -> vector<8x4xf32>
    %c0_27 = arith.constant 0 : index
    %c0_28 = arith.constant 0 : index
    %49 = vector.load %arg8[%c0_27, %c0_28] : memref<1x4xf32, #tpu.memory_space<vmem>>, vector<1x4xf32>
    %50 = vector.broadcast %49 : vector<1x4xf32> to vector<8x4xf32>
    %51 = arith.addf %48, %50 : vector<8x4xf32>
    %cst_29 = arith.constant 0.000000e+00 : f32
    %52 = vector.broadcast %cst_29 : f32 to vector<8x4xf32>
    %53 = arith.maximumf %51, %52 : vector<8x4xf32>
    %cst_30 = arith.constant 5.000000e-01 : f32
    %54 = vector.broadcast %cst_30 : f32 to vector<8x4xf32>
    %55 = arith.mulf %46, %54 : vector<8x4xf32>
    %56 = arith.truncf %55 : vector<8x4xf32> to vector<8x4xbf16>
    %cst_31 = arith.constant 5.000000e-01 : f32
    %57 = vector.broadcast %cst_31 : f32 to vector<8x4xf32>
    %58 = arith.mulf %53, %57 : vector<8x4xf32>
    %59 = arith.truncf %58 : vector<8x4xf32> to vector<8x4xbf16>
    %c0_32 = arith.constant 0 : index
    %c0_33 = arith.constant 0 : index
    %60 = vector.load %arg9[%c0_32, %c0_33] : memref<4x4xbf16, #tpu.memory_space<vmem>>, vector<4x4xbf16>
    %cst_34 = arith.constant dense<0.000000e+00> : vector<4x8xf32>
    %61 = tpu.matmul %60, %4, %cst_34 {dimension_numbers = #tpu.dot_dimension_numbers<[1], [1], [0], [0], [0, 0, 1, 0], [], []>} : vector<4x4xbf16>, vector<8x4xbf16>, vector<4x8xf32> -> vector<4x8xf32>
    %c0_35 = arith.constant 0 : index
    %c0_36 = arith.constant 0 : index
    %62 = vector.load %arg10[%c0_35, %c0_36] : memref<4x1xf32, #tpu.memory_space<vmem>>, vector<4x1xf32>
    %63 = vector.broadcast %62 : vector<4x1xf32> to vector<4x8xf32>
    %64 = arith.addf %61, %63 : vector<4x8xf32>
    %cst_37 = arith.constant 0.000000e+00 : f32
    %65 = vector.broadcast %cst_37 : f32 to vector<4x8xf32>
    %66 = arith.maximumf %64, %65 : vector<4x8xf32>
    %67 = arith.truncf %66 : vector<4x8xf32> to vector<4x8xbf16>
    %cst_38 = arith.constant dense<0.000000e+00> : vector<8x256xf32>
    %68 = tpu.matmul %59, %35, %cst_38 {dimension_numbers = #tpu.dot_dimension_numbers<[1], [0], [0], [1], [0, 0, 1, 1], [], []>} : vector<8x4xbf16>, vector<4x256xbf16>, vector<8x256xf32> -> vector<8x256xf32>
    %cst_39 = arith.constant dense<0xFF800000> : vector<256xf32>
    %69 = vector.multi_reduction <maximumf>, %68, %cst_39 [0] : vector<8x256xf32> to vector<256xf32>
    %70 = vector.shape_cast %69 : vector<256xf32> to vector<1x256xf32>
    %71 = vector.broadcast %70 : vector<1x256xf32> to vector<8x256xf32>
    %72 = arith.subf %68, %71 : vector<8x256xf32>
    %73 = math.exp %72 : vector<8x256xf32>
    %cst_40 = arith.constant dense<0.000000e+00> : vector<256xf32>
    %74 = vector.multi_reduction <add>, %73, %cst_40 [0] : vector<8x256xf32> to vector<256xf32>
    %75 = vector.shape_cast %74 : vector<256xf32> to vector<1x256xf32>
    %76 = tpu.reciprocal %75 {approx = true} : vector<1x256xf32> -> vector<1x256xf32>
    %77 = vector.broadcast %76 : vector<1x256xf32> to vector<8x256xf32>
    %78 = arith.mulf %73, %77 : vector<8x256xf32>
    %79 = arith.truncf %78 : vector<8x256xf32> to vector<8x256xbf16>
    %cst_41 = arith.constant dense<0.000000e+00> : vector<4x256xf32>
    %80 = tpu.matmul %67, %79, %cst_41 {dimension_numbers = #tpu.dot_dimension_numbers<[1], [0], [0], [1], [0, 0, 1, 1], [], []>} : vector<4x8xbf16>, vector<8x256xbf16>, vector<4x256xf32> -> vector<4x256xf32>
    %c0_42 = arith.constant 0 : index
    %c0_43 = arith.constant 0 : index
    %81 = vector.load %arg11[%c0_42, %c0_43] : memref<4x4xbf16, #tpu.memory_space<vmem>>, vector<4x4xbf16>
    %82 = arith.truncf %80 : vector<4x256xf32> to vector<4x256xbf16>
    %cst_44 = arith.constant dense<0.000000e+00> : vector<4x256xf32>
    %83 = tpu.matmul %81, %82, %cst_44 {dimension_numbers = #tpu.dot_dimension_numbers<[1], [0], [0], [1], [0, 0, 1, 1], [], []>} : vector<4x4xbf16>, vector<4x256xbf16>, vector<4x256xf32> -> vector<4x256xf32>
    %c0_45 = arith.constant 0 : index
    %c0_46 = arith.constant 0 : index
    %c0_47 = arith.constant 0 : index
    %84 = vector.load %arg12[%c0_45, %c0_46, %c0_47] : memref<2x4x1xf32, #tpu.memory_space<vmem>>, vector<1x4x1xf32>
    %85 = vector.shape_cast %84 : vector<1x4x1xf32> to vector<4x1xf32>
    %c1_48 = arith.constant 1 : index
    %c0_49 = arith.constant 0 : index
    %c0_50 = arith.constant 0 : index
    %86 = vector.load %arg12[%c1_48, %c0_49, %c0_50] : memref<2x4x1xf32, #tpu.memory_space<vmem>>, vector<1x4x1xf32>
    %87 = vector.shape_cast %86 : vector<1x4x1xf32> to vector<4x1xf32>
    %cst_51 = arith.constant dense<0.000000e+00> : vector<4xf32>
    %88 = vector.multi_reduction <add>, %83, %cst_51 [1] : vector<4x256xf32> to vector<4xf32>
    %89 = vector.shape_cast %88 : vector<4xf32> to vector<4x1xf32>
    %cst_52 = arith.constant 3.906250e-03 : f32
    %90 = vector.broadcast %cst_52 : f32 to vector<4x1xf32>
    %91 = arith.mulf %89, %90 : vector<4x1xf32>
    %92 = arith.mulf %83, %83 : vector<4x256xf32>
    %cst_53 = arith.constant dense<0.000000e+00> : vector<4xf32>
    %93 = vector.multi_reduction <add>, %92, %cst_53 [1] : vector<4x256xf32> to vector<4xf32>
    %94 = vector.shape_cast %93 : vector<4xf32> to vector<4x1xf32>
    %cst_54 = arith.constant 3.906250e-03 : f32
    %95 = vector.broadcast %cst_54 : f32 to vector<4x1xf32>
    %96 = arith.mulf %94, %95 : vector<4x1xf32>
    %97 = arith.mulf %91, %91 : vector<4x1xf32>
    %98 = arith.subf %96, %97 : vector<4x1xf32>
    %cst_55 = arith.constant 9.99999974E-6 : f32
    %99 = vector.broadcast %cst_55 : f32 to vector<4x1xf32>
    %100 = arith.addf %98, %99 : vector<4x1xf32>
    %101 = math.rsqrt %100 : vector<4x1xf32>
    %102 = arith.mulf %101, %85 : vector<4x1xf32>
    %103 = arith.mulf %91, %102 : vector<4x1xf32>
    %104 = arith.subf %87, %103 : vector<4x1xf32>
    %105 = vector.broadcast %102 : vector<4x1xf32> to vector<4x256xf32>
    %106 = arith.mulf %83, %105 : vector<4x256xf32>
    %107 = vector.broadcast %104 : vector<4x1xf32> to vector<4x256xf32>
    %108 = arith.addf %106, %107 : vector<4x256xf32>
    %c0_56 = arith.constant 0 : index
    %c0_57 = arith.constant 0 : index
    %c0_58 = arith.constant 0 : index
    %109 = vector.load %arg15[%c0_56, %c0_57, %c0_58] : memref<1x4x256xf32, #tpu.memory_space<vmem>>, vector<1x4x256xf32>
    %110 = vector.shape_cast %109 : vector<1x4x256xf32> to vector<4x256xf32>
    %111 = vector.shape_cast %108 : vector<4x256xf32> to vector<1x4x256xf32>
    tpu.vector_store %arg15[%c0_56, %c0_57, %c0_58], %111 {strides = array<i32>} : memref<1x4x256xf32, #tpu.memory_space<vmem>>, vector<1x4x256xf32>,
    %cst_59 = arith.constant dense<0.000000e+00> : vector<8x256xf32>
    %112 = tpu.matmul %56, %37, %cst_59 {dimension_numbers = #tpu.dot_dimension_numbers<[1], [0], [0], [1], [0, 0, 1, 1], [], []>} : vector<8x4xbf16>, vector<4x256xbf16>, vector<8x256xf32> -> vector<8x256xf32>
    %cst_60 = arith.constant dense<0xFF800000> : vector<8xf32>
    %113 = vector.multi_reduction <maximumf>, %112, %cst_60 [1] : vector<8x256xf32> to vector<8xf32>
    %114 = vector.shape_cast %113 : vector<8xf32> to vector<8x1xf32>
    %115 = vector.broadcast %114 : vector<8x1xf32> to vector<8x256xf32>
    %116 = arith.subf %112, %115 : vector<8x256xf32>
    %117 = math.exp %116 : vector<8x256xf32>
    %cst_61 = arith.constant dense<0.000000e+00> : vector<8xf32>
    %118 = vector.multi_reduction <add>, %117, %cst_61 [1] : vector<8x256xf32> to vector<8xf32>
    %119 = vector.shape_cast %118 : vector<8xf32> to vector<8x1xf32>
    %120 = tpu.reciprocal %119 {approx = true} : vector<8x1xf32> -> vector<8x1xf32>
    %121 = vector.broadcast %120 : vector<8x1xf32> to vector<8x256xf32>
    %122 = arith.mulf %117, %121 : vector<8x256xf32>
    %123 = arith.truncf %122 : vector<8x256xf32> to vector<8x256xbf16>
    %cst_62 = arith.constant dense<0.000000e+00> : vector<4x8xf32>
    %124 = tpu.matmul %39, %123, %cst_62 {dimension_numbers = #tpu.dot_dimension_numbers<[1], [1], [0], [0], [0, 0, 1, 0], [], []>} : vector<4x256xbf16>, vector<8x256xbf16>, vector<4x8xf32> -> vector<4x8xf32>
    %c0_63 = arith.constant 0 : index
    %c0_64 = arith.constant 0 : index
    %125 = vector.load %arg13[%c0_63, %c0_64] : memref<4x4xbf16, #tpu.memory_space<vmem>>, vector<4x4xbf16>
    %126 = arith.truncf %124 : vector<4x8xf32> to vector<4x8xbf16>
    %cst_65 = arith.constant dense<0.000000e+00> : vector<4x8xf32>
    %127 = tpu.matmul %125, %126, %cst_65 {dimension_numbers = #tpu.dot_dimension_numbers<[1], [0], [0], [1], [0, 0, 1, 1], [], []>} : vector<4x4xbf16>, vector<4x8xbf16>, vector<4x8xf32> -> vector<4x8xf32>
    %c0_66 = arith.constant 0 : index
    %c0_67 = arith.constant 0 : index
    %128 = vector.load %arg14[%c0_66, %c0_67] : memref<4x1xf32, #tpu.memory_space<vmem>>, vector<4x1xf32>
    %129 = vector.broadcast %128 : vector<4x1xf32> to vector<4x8xf32>
    %130 = arith.addf %127, %129 : vector<4x8xf32>
    %c0_68 = arith.constant 0 : index
    %c0_69 = arith.constant 0 : index
    %c0_70 = arith.constant 0 : index
    %131 = vector.load %arg16[%c0_68, %c0_69, %c0_70] : memref<1x4x8xf32, #tpu.memory_space<vmem>>, vector<1x4x8xf32>
    %132 = vector.shape_cast %131 : vector<1x4x8xf32> to vector<4x8xf32>
    %133 = vector.shape_cast %130 : vector<4x8xf32> to vector<1x4x8xf32>
    tpu.vector_store %arg16[%c0_68, %c0_69, %c0_70], %133 {strides = array<i32>} : memref<1x4x8xf32, #tpu.memory_space<vmem>>, vector<1x4x8xf32>,
    return
  }
  func.func @transform_0(%arg0: i32) -> (i32, i32, i32) {
    %c0_i32 = arith.constant 0 : i32
    %c0_i32_0 = arith.constant 0 : i32
    %c0_i32_1 = arith.constant 0 : i32
    return %arg0, %c0_i32, %c0_i32_0 : i32, i32, i32
  }
  func.func @transform_1(%arg0: i32) -> (i32, i32, i32) {
    %c0_i32 = arith.constant 0 : i32
    %c0_i32_0 = arith.constant 0 : i32
    %c0_i32_1 = arith.constant 0 : i32
    return %arg0, %c0_i32, %c0_i32_0 : i32, i32, i32
  }
  func.func @transform_2(%arg0: i32) -> (i32, i32) {
    %c0_i32 = arith.constant 0 : i32
    %c0_i32_0 = arith.constant 0 : i32
    %c0_i32_1 = arith.constant 0 : i32
    return %c0_i32, %c0_i32_0 : i32, i32
  }
  func.func @transform_3(%arg0: i32) -> (i32, i32, i32) {
    %c0_i32 = arith.constant 0 : i32
    %c0_i32_0 = arith.constant 0 : i32
    %c0_i32_1 = arith.constant 0 : i32
    %c0_i32_2 = arith.constant 0 : i32
    return %c0_i32, %c0_i32_0, %c0_i32_1 : i32, i32, i32
  }
  func.func @transform_4(%arg0: i32) -> (i32, i32) {
    %c0_i32 = arith.constant 0 : i32
    %c0_i32_0 = arith.constant 0 : i32
    %c0_i32_1 = arith.constant 0 : i32
    return %c0_i32, %c0_i32_0 : i32, i32
  }
  func.func @transform_5(%arg0: i32) -> (i32, i32) {
    %c0_i32 = arith.constant 0 : i32
    %c0_i32_0 = arith.constant 0 : i32
    %c0_i32_1 = arith.constant 0 : i32
    return %c0_i32, %c0_i32_0 : i32, i32
  }
  func.func @transform_6(%arg0: i32) -> (i32, i32) {
    %c0_i32 = arith.constant 0 : i32
    %c0_i32_0 = arith.constant 0 : i32
    %c0_i32_1 = arith.constant 0 : i32
    return %c0_i32, %c0_i32_0 : i32, i32
  }
  func.func @transform_7(%arg0: i32) -> (i32, i32) {
    %c0_i32 = arith.constant 0 : i32
    %c0_i32_0 = arith.constant 0 : i32
    %c0_i32_1 = arith.constant 0 : i32
    return %c0_i32, %c0_i32_0 : i32, i32
  }
  func.func @transform_8(%arg0: i32) -> (i32, i32) {
    %c0_i32 = arith.constant 0 : i32
    %c0_i32_0 = arith.constant 0 : i32
    %c0_i32_1 = arith.constant 0 : i32
    return %c0_i32, %c0_i32_0 : i32, i32
  }
  func.func @transform_9(%arg0: i32) -> (i32, i32) {
    %c0_i32 = arith.constant 0 : i32
    %c0_i32_0 = arith.constant 0 : i32
    %c0_i32_1 = arith.constant 0 : i32
    return %c0_i32, %c0_i32_0 : i32, i32
  }
  func.func @transform_10(%arg0: i32) -> (i32, i32) {
    %c0_i32 = arith.constant 0 : i32
    %c0_i32_0 = arith.constant 0 : i32
    %c0_i32_1 = arith.constant 0 : i32
    return %c0_i32, %c0_i32_0 : i32, i32
  }
  func.func @transform_11(%arg0: i32) -> (i32, i32, i32) {
    %c0_i32 = arith.constant 0 : i32
    %c0_i32_0 = arith.constant 0 : i32
    %c0_i32_1 = arith.constant 0 : i32
    %c0_i32_2 = arith.constant 0 : i32
    return %c0_i32, %c0_i32_0, %c0_i32_1 : i32, i32, i32
  }
  func.func @transform_12(%arg0: i32) -> (i32, i32) {
    %c0_i32 = arith.constant 0 : i32
    %c0_i32_0 = arith.constant 0 : i32
    %c0_i32_1 = arith.constant 0 : i32
    return %c0_i32, %c0_i32_0 : i32, i32
  }
  func.func @transform_13(%arg0: i32) -> (i32, i32) {
    %c0_i32 = arith.constant 0 : i32
    %c0_i32_0 = arith.constant 0 : i32
    %c0_i32_1 = arith.constant 0 : i32
    return %c0_i32, %c0_i32_0 : i32, i32
  }
  func.func @transform_14(%arg0: i32) -> (i32, i32, i32) {
    %c0_i32 = arith.constant 0 : i32
    %c0_i32_0 = arith.constant 0 : i32
    %c0_i32_1 = arith.constant 0 : i32
    return %arg0, %c0_i32, %c0_i32_0 : i32, i32, i32
  }
  func.func @transform_15(%arg0: i32) -> (i32, i32, i32) {
    %c0_i32 = arith.constant 0 : i32
    %c0_i32_0 = arith.constant 0 : i32
    %c0_i32_1 = arith.constant 0 : i32
    return %arg0, %c0_i32, %c0_i32_0 : i32, i32, i32
  }
}

</mosaic_0001>

<bundles_post_ra>
// kernel: tpu_custom_call.1
= control target key start
LH: loop header
LB: loop body
LE: loop exit
PB: predicated region body
PF: predicated region fallthrough
CT: control target
= control target key end

     0   :  { %s1951_s0 = inlined_call_operand.vmem [shape: bf16[2,4,256], index: 0, kind: input, shape index: {}]   ;;  %s1952_s1 = inlined_call_operand.vmem [shape: f32[2,8,4], index: 1, kind: input, shape index: {}]   ;;  %s1953_s2 = inlined_call_operand.vmem [shape: bf16[12,4], index: 2, kind: input, shape index: {}]   ;;  %s1954_s3 = inlined_call_operand.vmem [shape: f32[2,12,1], index: 3, kind: input, shape index: {}]   ;;  %s1955_s4 = inlined_call_operand.vmem [shape: bf16[4,4], index: 4, kind: input, shape index: {}]   ;;  %s1956_s5 = inlined_call_operand.vmem [shape: f32[1,4], index: 5, kind: input, shape index: {}]   ;;  %s1957_s6 = inlined_call_operand.vmem [shape: bf16[4,4], index: 6, kind: input, shape index: {}]   ;;  %s1958_s7 = inlined_call_operand.vmem [shape: f32[1,4], index: 7, kind: input, shape index: {}]   ;;  %s1959_s8 = inlined_call_operand.vmem [shape: bf16[4,4], index: 8, kind: input, shape index: {}]   ;;  %s1960_s9 = inlined_call_operand.vmem [shape: f32[4,1], index: 9, kind: input, shape index: {}]   ;;  %s1961_s10 = inlined_call_operand.vmem [shape: bf16[4,4], index: 10, kind: input, shape index: {}]   ;;  %s1962_s11 = inlined_call_operand.vmem [shape: f32[2,4,1], index: 11, kind: input, shape index: {}]   ;;  %s1963_s12 = inlined_call_operand.vmem [shape: bf16[4,4], index: 12, kind: input, shape index: {}]   ;;  %s1964_s13 = inlined_call_operand.vmem [shape: f32[4,1], index: 13, kind: input, shape index: {}]   ;;  %s1965_s14 = inlined_call_operand.hbm [shape: f32[2,4,256], index: 14, kind: output, shape index: {0}]   ;;  %s1966_s15 = inlined_call_operand.hbm [shape: f32[2,4,8], index: 15, kind: output, shape index: {1}]  }
   0x1   :  { %1971 = sst [smem:[#allocation12_spill]] %s1951_s0 }
   0x2   :  { %1972 = sst [smem:[#allocation13_spill]] %s1952_s1 }
   0x3   :  { %1973 = sst [smem:[#allocation14_spill]] %s1953_s2 }
   0x4   :  { %21 = vsyncpa [#allocation3], 0 }
   0x5   :  { %23 = vsyncpa [#allocation3 + $0x1], 0 }
   0x6   :  { %24 = vsyncpa [#allocation5], 0 }
   0x7   :  { %26 = vsyncpa [#allocation5 + $0x1], 0  ;;  %s1696_s18 = smov 0   ;;  %s1698_s19 = smov 0  }
   0x8   :  { %s1700_s20 = smov 0   ;;  %s1702_s21 = smov 0  }
   0x9 LB: > { %1974 = sst [smem:[#allocation8_spill]] %s1605_s20  ;;  %s1717_s22 = sadd.s32 4294967295, %s1609_s21   ;;  %s1609_s21 = sphi %s1702_s21, %s1984_s21   ;;  %s1605_s20 = sphi %s1700_s20, %s1986_s20   ;;  %s1601_s19 = sphi %s1698_s19, %s1988_s19   ;;  %s1597_s18 = sphi %s1696_s18, %s1987_s18  }
   0xa   : > { %s1374_s23 = sadd.s32 4294967294, %s1609_s21   ;;  %s1721_s24 = sadd.s32 1, %s1609_s21  }
   0xb   : > { %1975 = sst [smem:[#allocation9_spill]] %s1721_s24  ;;  %s343_s25 = sadd.s32 1, %s1605_s20 }
   0xc   : > { %s340_s26 = ssub.s32 %s1609_s21, %s1721_s24  ;;  %p353_p0 = scmp.ne.s32.totalorder %s1605_s20, %s1601_s19 }
   0xd   : > { %p341_p1 = scmp.eq.s32.totalorder %s340_s26, 0  ;;  %p354_p2 = scmp.eq.s32.totalorder %s1717_s22, 1 }
   0xe   : > { %p359_p3 = scmp.ne.s32.totalorder %s1601_s19, %s1597_s18  ;;  %p360_p4 = scmp.eq.s32.totalorder %s1374_s23, 1 }
   0xf   : > { %s1732_s27 = scalar_select %p341_p1, %s1605_s20, %s343_s25  }
  0x10   : > { %p1734_p5 = por %p354_p2, %p353_p0  ;;  %p1738_p6 = por %p360_p4, %p359_p3 }
  0x11   : > { %1976 = sst [smem:[#allocation10_spill]] %s1732_s27  ;;  %p1377_p7 = scmp.ge.s32.totalorder %s1609_s21, 1 }
  0x12   : > { %s1978_s29 = scalar_select %p1738_p6, 1, 0 }
  0x13   : > { %p455_p8 = scmp.lt.s32.totalorder %s1609_s21, 3 }
  0x14   : > { %1979 = sst [smem:[#allocation11_spill]] %s1978_s29 }
  0x15   : > { %p456_p9 = pnand %p1377_p7, %p455_p8 }
  0x16   : > { %p512_p10 = scmp.lt.s32.totalorder (!%p456_p9), %s1717_s22, 1  ;;  %v1611_v0 = vmov (!%p456_p9), 0   ;;  %vm545_vm0 = vcmask (!%p456_p9), 1041408   ;;  %s1980_s0 = sld [smem:[#allocation12_spill]] (!%p456_p9)  ;;  %vm541_vm1 = vcmask (!%p456_p9), 31744   ;;  %v1612_v8 = vmov (!%p456_p9), 0.0  }
  0x17   : > { %459 = sbr.rel (%p456_p9) target bundleno = 1828 (0x724), region = 76  ;;  %584 = vmatprep.mubr.bf16.mxu0 (!%p456_p9), %v1611_v0  ;;  %1492 = vset.pattern.permute.xlu1 (!%p456_p9), %v1611_v0  ;;  %s1981_s2 = sld [smem:[#allocation14_spill]] (!%p456_p9)  ;;  %v730_v6 = vld [vmem:[%s1957_s6] sm:$0x3] (!%p456_p9)  ;;  %vm1613_vm2 = vmmov (!%p456_p9), 0   ;;  %vm603_vm3 = vcmask (!%p456_p9), 1043456  }
  0x18   : > { %1493 = vset.pattern.permute.xlu0 (!%p456_p9), %v1611_v0  ;;  %s1982_s1 = sld [smem:[#allocation13_spill]] (!%p456_p9)  ;;  %v739_v9 = vsel (!%p456_p9), %vm545_vm0, %v730_v6, 0  ;;  %1421 = vmatprep.subr.bf16.mxu1 (!%p456_p9), %v1612_v8  ;;  %v595_v33 = vld [vmem:[%s1954_s3] sm:$0xff] (!%p456_p9)  ;;  %v1387_v36 = vld [vmem:[%s1954_s3 + $0x10] sm:$0xff] (!%p456_p9)  ;;  %vm924_vm4 = vcmask (!%p456_p9), 64512   ;;  %s1871_s26 = sand.u32 (!%p456_p9), 1, %s1601_s19  }
  0x19   : > { %1423 = vmatprep.mubr.msk.bf16.mxu1 (!%p456_p9), %vm1613_vm2, %v1612_v8  ;;  %v675_v43 = vld [vmem:[%s1955_s4] sm:$0x3] (!%p456_p9)  ;;  %s1412_s24 = sshll.u32 (!%p456_p9), %s1717_s22, 7 }
  0x1a   : > { %v687_v44 = vsel (!%p456_p9), %vm545_vm0, %v675_v43, 0  ;;  %v787_v45 = vld [vmem:[%s1960_s9] sm:$0xf] (!%p456_p9) }
  0x1b   : > { %1422 = vmatpush3.bf16.msra.mxu1 (!%p456_p9), %v687_v44  ;;  %v786_v47 = vld [vmem:[%s1959_s8] sm:$0x3] (!%p456_p9) }
  0x1c   : > { %1433 = vmatprep.subr.bf16.mxu1 (!%p456_p9), %v1612_v8  ;;  %v1391_v48 = vld [vmem:[%s1958_s7] ss:$0 sm:$0xff] (!%p456_p9) }
  0x1d   : > { %v1494_v4 = vld [vmem:[%s1981_s2] sm:$0x3f] (!%p456_p9)  }
  0x1e   : > { %s513_s30 = scalar_select %p512_p10, %s1717_s22, 1 }
  0x20   : > { %s1411_s16 = sshll.u32 %s513_s30, 2  ;;  %s1382_s20 = sshll.u32 %s513_s30, 3 }
  0x21   : > { %s516_s25 = scalar_lea.vmem %s1980_s0, %s1411_s16  ;;  %s520_s17 = scalar_lea.vmem %s1982_s1, %s1382_s20 }
  0x22   : > { %v1384_v1 = vld.sshfl [vmem:[%s516_s25] sm:$0x33 pattern:$0x76325410]  ;;  %s1883_s25 = scalar_lea.hbm %s1965_s14, %s1412_s24  ;;  %s1614_s1 = smov [#allocation2]  }
  0x23   : > { %v540_v2 = vcombine.high %v1384_v1, %v1384_v1  ;;  %v547_v3 = vsel %vm545_vm0, %v1384_v1, 0  ;;  %v523_v5 = vld [vmem:[%s520_s17] sm:$0xff]  ;;  %s1378_s17 = sshll.u32 %s1871_s26, 3  ;;  %s1519_s2 = sshll.u32 %s1614_s1, 4  ;;  %s1520_s2 = int_to_ptr.vmem [resolvable:$false] %s1519_s2 }
  0x24   : > { %v524_v7 = vpack.c.bf16 %v523_v5, %v523_v5  ;;  %s504_s16 = scalar_lea.vmem [#allocation2], %s1378_s17  ;;  %s1239_s17 = scalar_lea.sflag [#allocation3], %s1871_s26 }
  0x25   : > { %1385 = vmatprep.subr.msk.bf16.mxu0 %vm545_vm0, %v540_v2  ;;  %s1258_s27 = sshll.u32 %s504_s16, 4  ;;  %s1521_s23 = scalar_lea.vmem %s1520_s2, 256  ;;  %s1259_s27 = int_to_ptr.vmem [resolvable:$true] %s1258_s27 }
  0x26   : > { %553 = vmatpush1.bf16.msra.mxu0 %v547_v3  ;;  %1424 = vmatmul.mubr.msk.bf16.vlgmr.msra.gmra.mrb[0].mxu1 %vm541_vm1, %v524_v7  ;;  %v684_v46 = vsel %vm541_vm1, %v524_v7, 0  ;;  %s1515_s0 = scalar_lea.vmem %s1259_s27, 128  ;;  %p1522_p0 = scmp.lt.s32.totalorder %s1259_s27, %s1520_s2 }
  0x27   : > { %1427 = vmatprep.subr.bf16.mxu0 %v1612_v8  ;;  %1435 = vmatprep.mubr.msk.bf16.mxu1 %vm1613_vm2, %v1612_v8  ;;  %p1516_p11 = scmp.ne.s32.totalorder %s1259_s27, %s1515_s0  ;;  %p1523_p1 = scmp.lt.s32.totalorder %s1521_s23, %s1515_s0 }
  0x28   : > { %1434 = vmatpush3.bf16.xpose.msra.mxu1 %v684_v46 }
  0x29   : > { %1386 = vmatmul.mubr.msk.bf16.vlgmr.msra.gmra.mrb[0].mxu0 %vm541_vm1, %v1494_v4  ;;  %p1517_p12 = pnand %p1516_p11, %p1734_p5  ;;  %p1524_p2 = por %p1523_p1, %p1522_p0 }
  0x2a   : > { %1429 = vmatprep.mubr.msk.bf16.mxu0 %vm1613_vm2, %v1612_v8  ;;  %1428 = vmatpush3.bf16.msra.mxu0 %v739_v9 }
  0x2b   : > { %p1518_p13 = pneg %p1517_p12 }
  0x2d   : > { %p1525_p3 = pnand %p1524_p2, %p1518_p13 }
  0x2f   : > { %1436 = vmatmul.mubr.msk.bf16.vlgmr.msra.gmra.mrb[4].mxu1 %vm541_vm1, %v786_v47 }
  0x30   : > { %966 = vmatprep.mubr.bf16.mxu1 %v1611_v0 }
  0x31   : > { %1430 = vmatmul.mubr.msk.bf16.vlgmr.msra.gmra.mrb[4].mxu0 %vm541_vm1, %v524_v7 }
  0x32   : > { %879 = vmatprep.mubr.bf16.mxu0 %v1611_v0 }
  0xf9   : > { %v723_v1 = vpop.f32.mrb[0].mxu1 }
  0xfa   : > { %v1425_v2 = vpop.f32.mrb[1].mxu1 }
  0xfb   : > { %v726_v3 = vpop.f32.mrb[2].mxu1 }
  0xfc   : > { %v586_v10 = vpop.f32.mrb[0].mxu0  ;;  %v1426_v4 = vpop.f32.mrb[3].mxu1 }
  0xfd   : > { %v588_v11 = vpop.f32.mrb[1].mxu0  ;;  %v611_v12 = vmul.f32 %v586_v10, %v586_v10 }
  0xfe   : > { %v1773_v13 = vpop.f32.mrb[2].mxu0  ;;  %v600_v14 = vadd.f32 %v588_v11, %v586_v10  ;;  %v612_v15 = vmul.f32 %v588_v11, %v588_v11 }
  0xff   : > { %v613_v16 = vmul.f32 %v1773_v13, %v1773_v13  ;;  %v1777_v17 = vpop.f32.mrb[3].mxu0  ;;  %v604_v18 = vsel %vm603_vm3, %v1773_v13, 0.0 }
 0x100   : > { %v614_v19 = vmul.f32 %v1777_v17, %v1777_v17  ;;  %601 = vadd.xlane.f32.xlu0 %v600_v14  ;;  %v615_v20 = vadd.f32 %v612_v15, %v611_v12  ;;  %v605_v21 = vsel %vm603_vm3, %v1777_v17, 0.0 }
 0x101   : > { %v1785_v22 = vadd.f32 %v605_v21, %v604_v18  ;;  %v618_v23 = vsel %vm603_vm3, %v613_v16, 0.0 }
 0x102   : > { %v619_v24 = vsel %vm603_vm3, %v614_v19, 0.0  ;;  %v830_v5 = vpop.f32.mrb[4].mxu1 }
 0x103   : > { %v1789_v25 = vadd.f32 %v619_v24, %v618_v23  ;;  %v1437_v6 = vpop.f32.mrb[5].mxu1 }
 0x104   : > { %616 = vadd.xlane.f32.xlu0 %v615_v20  ;;  %v775_v38 = vpop.f32.mrb[4].mxu0  ;;  %v833_v7 = vpop.f32.mrb[6].mxu1 }
 0x105   : > { %v1431_v39 = vpop.f32.mrb[5].mxu0  ;;  %v776_v49 = vadd.f32 %v1391_v48, %v775_v38  ;;  %v1438_v9 = vpop.f32.mrb[7].mxu1 }
 0x106   : > { %v778_v41 = vpop.f32.mrb[6].mxu0 }
 0x107   : > { %v1432_v42 = vpop.f32.mrb[7].mxu0  ;;  %v781_v53 = vmax.f32 %v776_v49, 0.0 }
 0x109   : > { %v784_v57 = vmul.f32 0.5, %v781_v53 }
 0x10b   : > { %v785_v62 = vpack.c.bf16 %v784_v57, %v784_v57 }
 0x11a   : > { %790 = vperm.xlu0 %1493, %v787_v45  }
 0x18d   : > { %v602_v26 = vpop.xlane.xlu0 %601 }
 0x18e   : > { %v609_v27 = vmul.f32 0.00390625, %v602_v26 }
 0x190   : > { %v625_v29 = vmul.f32 %v609_v27, %v609_v27 }
 0x191   : > { %v617_v28 = vpop.xlane.xlu0 %616 }
 0x192   : > { %v623_v30 = vmul.f32 0.00390625, %v617_v28 }
 0x194   : > { %v627_v31 = vsub.f32 %v623_v30, %v625_v29 }
 0x196   : > { %v629_v32 = vadd.f32 1e-05, %v627_v31 }
 0x198   : > { %1495 = vrsqrt.f32 %v629_v32 }
 0x199   : > { %v791_v48 = vpop.permute.xlu0 %790 }
 0x19a   : > { %v831_v49 = vadd.f32 %v830_v5, %v791_v48 }
 0x1a2   : > { %v1496_v34 = vpop.eup %1495 }
 0x1a3   : > { %v633_v35 = vmul.f32 %v1496_v34, %v595_v33 }
 0x1a5   : > { %641 = vperm.xlu1 %1492, %v633_v35   ;;  %v635_v37 = vmul.f32 %v633_v35, %v609_v27 }
 0x1a7   : > { %v637_v40 = vsub.f32 %v1387_v36, %v635_v37 }
 0x1a9   : > { %655 = vperm.xlu1 %1492, %v637_v40  }
 0x224   : > { %v642_v50 = vpop.permute.xlu1 %641 }
 0x225   : > { %v649_v51 = vmul.f32 %v642_v50, %v586_v10  ;;  %v650_v52 = vmul.f32 %v642_v50, %v588_v11 }
 0x228   : > { %v656_v54 = vpop.permute.xlu1 %655 }
 0x229   : > { %v663_v55 = vadd.f32 %v656_v54, %v649_v51  ;;  %v664_v56 = vadd.f32 %v656_v54, %v650_v52  ;;  %v1389_v52 = vld [vmem:[%s1956_s5] ss:$0 sm:$0xff]  ;;  %v836_v54 = vmax.f32 %v831_v49, 0.0 }
 0x22a   : > { %v724_v57 = vadd.f32 %v1389_v52, %v723_v1 }
 0x22b   : > { %v667_v58 = vmax.f32 %v663_v55, 0.0  ;;  %v668_v59 = vmax.f32 %v664_v56, 0.0  ;;  %v837_v2 = vpack.c.bf16 %v836_v54, %v836_v54 }
 0x22c   : > { %v729_v3 = vmax.f32 %v724_v57, 0.0 }
 0x22d   : > { %v1817_v60 = vpack.c.bf16 %v667_v58, %v667_v58  ;;  %v1819_v61 = vpack.c.bf16 %v668_v59, %v668_v59 }
 0x22e   : > { %v782_v1 = vmul.f32 0.5, %v729_v3 }
 0x22f   : > { %1394 = vmatprep.subr.msk.bf16.mxu0 %vm545_vm0, %v1819_v61  ;;  %v842_v63 = vsel %vm545_vm0, %v1817_v60, 0 }
 0x230   : > { %848 = vmatpush1.bf16.msra.mxu0 %v842_v63  ;;  %v1074_v63 = vrot.slane %v1819_v61, 2 }
 0x233   : > { %1395 = vmatmul.mubr.msk.bf16.vlgmr.msra.gmra.mrb[8].mxu0 %vm541_vm1, %v785_v62  ;;  %v1073_v62 = vrot.slane %v1817_v60, 2  ;;  %v783_v60 = vpack.c.bf16 %v782_v1, %v782_v1 }
 0x234   : > { %1019 = vmatprep.mubr.bf16.mxu0 %v1611_v0 }
 0x235   : > { %v1079_v4 = vsel %vm545_vm0, %v1073_v62, 0 }
 0x306   : > { %v881_v10 = vpop.f32.mrb[8].mxu0 }
 0x307   : > { %v888_v11 = vrot.slane %v881_v10, 4  ;;  %v883_v12 = vpop.f32.mrb[9].mxu0 }
 0x308   : > { %v894_v14 = vrot.slane %v883_v12, 4  ;;  %v885_v15 = vpop.f32.mrb[10].mxu0 }
 0x309   : > { %v889_v16 = vmax.f32 %v881_v10, %v888_v11  ;;  %v886_v18 = vpop.f32.mrb[11].mxu0 }
 0x30a   : > { %v895_v19 = vmax.f32 %v883_v12, %v894_v14 }
 0x30b   : > { %v890_v20 = vrot.slane %v889_v16, 2 }
 0x30c   : > { %v896_v21 = vrot.slane %v895_v19, 2 }
 0x30d   : > { %v891_v23 = vmax.f32 %v889_v16, %v890_v20 }
 0x30e   : > { %v897_v24 = vmax.f32 %v895_v19, %v896_v21 }
 0x30f   : > { %v892_v26 = vrot.slane %v891_v23, 1 }
 0x310   : > { %v898_v27 = vrot.slane %v897_v24, 1 }
 0x311   : > { %v893_v28 = vmax.f32 %v891_v23, %v892_v26 }
 0x312   : > { %v899_v29 = vmax.f32 %v897_v24, %v898_v27 }
 0x313   : > { %v900_v30 = vsub.f32 %v881_v10, %v893_v28 }
 0x314   : > { %v901_v31 = vsub.f32 %v883_v12, %v899_v29 }
 0x315   : > { %v902_v32 = vmul.f32 1.442695, %v900_v30 }
 0x316   : > { %v904_v33 = vmul.f32 1.442695, %v901_v31 }
 0x317   : > { %1497 = vpow2.f32 %v902_v32 }
 0x318   : > { %1499 = vpow2.f32 %v904_v33 }
 0x321   : > { %v1498_v34 = vpop.eup %1497 }
 0x322   : > { %v1500_v35 = vpop.eup %1499  ;;  %v906_v36 = vrot.slane %v1498_v34, 4 }
 0x323   : > { %v912_v37 = vrot.slane %v1500_v35, 4 }
 0x324   : > { %v907_v38 = vadd.f32 %v1498_v34, %v906_v36  ;;  %v1388_v36 = vld [vmem:[%s1954_s3 + $0x18] sm:$0xf] }
 0x325   : > { %v913_v39 = vadd.f32 %v1500_v35, %v912_v37 }
 0x326   : > { %v908_v40 = vrot.slane %v907_v38, 2 }
 0x327   : > { %v914_v41 = vrot.slane %v913_v39, 2 }
 0x328   : > { %v909_v42 = vadd.f32 %v908_v40, %v907_v38 }
 0x329   : > { %v915_v43 = vadd.f32 %v914_v41, %v913_v39 }
 0x32a   : > { %v910_v44 = vrot.slane %v909_v42, 1 }
 0x32b   : > { %v916_v45 = vrot.slane %v915_v43, 1 }
 0x32c   : > { %v911_v46 = vadd.f32 %v910_v44, %v909_v42 }
 0x32d   : > { %v917_v47 = vadd.f32 %v916_v45, %v915_v43 }
 0x32e   : > { %1501 = vrcp.f32 %v911_v46 }
 0x32f   : > { %1503 = vrcp.f32 %v917_v47 }
 0x338   : > { %v1502_v50 = vpop.eup %1501 }
 0x339   : > { %v1504_v51 = vpop.eup %1503  ;;  %v920_v53 = vmul.f32 %v1502_v50, %v1498_v34 }
 0x33a   : > { %v921_v55 = vmul.f32 %v1504_v51, %v1500_v35  ;;  %v1184_v51 = vld [vmem:[%s1964_s13] sm:$0xf] }
 0x33b   : > { %v922_v56 = vpack.c.bf16 %v920_v53, %v920_v53 }
 0x33c   : > { %v923_v58 = vpack.c.bf16 %v921_v55, %v921_v55 }
 0x33d   : > { %v929_v59 = vsel %vm603_vm3, %v922_v56, 0 }
 0x33e   : > { %1396 = vmatprep.subr.msk.bf16.mxu1 %vm603_vm3, %v923_v58 }
 0x33f   : > { %935 = vmatpush1.bf16.msra.mxu1 %v929_v59 }
 0x340   : > { %1401 = vmatprep.subr.msk.bf16.mxu1 %vm545_vm0, %v1074_v63 }
 0x342   : > { %1397 = vmatmul.mubr.msk.bf16.vlgmr.msra.gmra.mrb[8].mxu1 %vm924_vm4, %v837_v2 }
 0x343   : > { %1085 = vmatpush1.bf16.msra.mxu1 %v1079_v4  ;;  %1116 = vmatprep.mubr.bf16.mxu1 %v1611_v0  ;;  %v975_v0 = vld [vmem:[%s1961_s10] sm:$0x3] }
 0x344   : > { %1439 = vmatprep.subr.bf16.mxu1 %v1612_v8 }
 0x34a   : > { %1402 = vmatmul.mubr.msk.bf16.vlgmr.msra.gmra.mrb[12].mxu1 %vm541_vm1, %v783_v60 }
 0x34b   : > { %1441 = vmatprep.mubr.msk.bf16.mxu1 %vm1613_vm2, %v1612_v8 }
 0x415   : > { %v968_v61 = vpop.f32.mrb[8].mxu1 }
 0x416   : > { %v976_v5 = vpack.c.bf16 %v968_v61, %v968_v61  ;;  %v970_v6 = vpop.f32.mrb[9].mxu1 }
 0x417   : > { %v977_v7 = vpack.c.bf16 %v970_v6, %v970_v6  ;;  %v972_v9 = vpop.f32.mrb[10].mxu1 }
 0x418   : > { %v982_v10 = vsel %vm545_vm0, %v976_v5, 0  ;;  %v973_v11 = vpop.f32.mrb[11].mxu1 }
 0x419   : > { %1398 = vmatprep.subr.msk.bf16.mxu0 %vm545_vm0, %v977_v7 }
 0x41a   : > { %988 = vmatpush1.bf16.msra.mxu0 %v982_v10 }
 0x41d   : > { %1399 = vmatmul.mubr.msk.bf16.vlgmr.msra.gmra.mrb[12].mxu0 %vm541_vm1, %v975_v0  ;;  %v1118_v12 = vpop.f32.mrb[12].mxu1 }
 0x41e   : > { %v1120_v14 = vpop.f32.mrb[13].mxu1 }
 0x41f   : > { %v1122_v8 = vpop.f32.mrb[14].mxu1  ;;  %v1125_v15 = vmax.f32 %v1118_v12, %v1120_v14 }
 0x420   : > { %v1123_v16 = vpop.f32.mrb[15].mxu1 }
 0x421   : > { %1126 = vmax.xlane.f32.xlu1 %v1125_v15 }
 0x425   : > { %607 = vadd.xlane.f32.xlu1 %v1785_v22 }
 0x429   : > { %621 = vadd.xlane.f32.xlu1 %v1789_v25  ;;  %v596_v25 = vld [vmem:[%s1954_s3 + $0x8] sm:$0xf] }
 0x4ae   : > { %v1127_v18 = vpop.xlane.xlu1 %1126 }
 0x4af   : > { %v1128_v19 = vsub.f32 %v1118_v12, %v1127_v18  ;;  %v1129_v20 = vsub.f32 %v1120_v14, %v1127_v18  ;;  %v1400_v14 = vld [vmem:[%s1962_s11 + $0x4] sm:$0xf] }
 0x4b1   : > { %v1130_v21 = vmul.f32 1.442695, %v1128_v19  ;;  %v1132_v23 = vmul.f32 1.442695, %v1129_v20 }
 0x4b2   : > { %v608_v24 = vpop.xlane.xlu1 %607 }
 0x4b3   : > { %1505 = vpow2.f32 %v1130_v21  ;;  %v610_v26 = vmul.f32 0.00390625, %v608_v24 }
 0x4b4   : > { %1507 = vpow2.f32 %v1132_v23 }
 0x4b5   : > { %v626_v28 = vmul.f32 %v610_v26, %v610_v26 }
 0x4b6   : > { %v622_v27 = vpop.xlane.xlu1 %621 }
 0x4b7   : > { %v624_v29 = vmul.f32 0.00390625, %v622_v27 }
 0x4b9   : > { %v628_v30 = vsub.f32 %v624_v29, %v626_v28 }
 0x4bb   : > { %v630_v31 = vadd.f32 1e-05, %v628_v30 }
 0x4bd   : > { %v1506_v32 = vpop.eup %1505  ;;  %1509 = vrsqrt.f32 %v630_v31 }
 0x4be   : > { %v1508_v33 = vpop.eup %1507 }
 0x4bf   : > { %v1134_v22 = vadd.f32 %v1508_v33, %v1506_v32 }
 0x4c1   : > { %1135 = vadd.xlane.f32.xlu0 %v1134_v22 }
 0x4c7   : > { %v1510_v34 = vpop.eup %1509 }
 0x4c8   : > { %v634_v35 = vmul.f32 %v1510_v34, %v596_v25 }
 0x4ca   : > { %646 = vperm.xlu1 %1492, %v634_v35   ;;  %v636_v37 = vmul.f32 %v634_v35, %v610_v26 }
 0x4cc   : > { %v638_v38 = vsub.f32 %v1388_v36, %v636_v37 }
 0x4ce   : > { %660 = vperm.xlu1 %1492, %v638_v38  }
 0x4f0   : > { %v1021_v39 = vpop.f32.mrb[12].mxu0 }
 0x4f1   : > { %v1037_v40 = vmul.f32 %v1021_v39, %v1021_v39  ;;  %v1023_v41 = vpop.f32.mrb[13].mxu0  ;;  %v1031_v42 = vsel %vm603_vm3, %v1021_v39, 0.0 }
 0x4f2   : > { %v1038_v43 = vmul.f32 %v1023_v41, %v1023_v41  ;;  %v1032_v44 = vsel %vm603_vm3, %v1023_v41, 0.0  ;;  %v1025_v45 = vpop.f32.mrb[14].mxu0 }
 0x4f3   : > { %v1033_v46 = vadd.f32 %v1032_v44, %v1031_v42  ;;  %v1039_v47 = vsel %vm603_vm3, %v1037_v40, 0.0  ;;  %v1026_v48 = vpop.f32.mrb[15].mxu0 }
 0x4f4   : > { %v1040_v49 = vsel %vm603_vm3, %v1038_v43, 0.0 }
 0x4f5   : > { %1034 = vadd.xlane.f32.xlu1 %v1033_v46  ;;  %v1041_v50 = vadd.f32 %v1040_v49, %v1039_v47 }
 0x4f7   : > { %1042 = vadd.xlane.f32.xlu0 %v1041_v50 }
 0x506   : > { %1187 = vperm.xlu1 %1492, %v1184_v51  }
 0x549   : > { %v647_v52 = vpop.permute.xlu1 %646 }
 0x54a   : > { %v652_v53 = vmul.f32 %v647_v52, %v1777_v17  ;;  %v651_v62 = vmul.f32 %v647_v52, %v1773_v13  ;;  %v1028_v13 = vld [vmem:[%s1962_s11] sm:$0xf] }
 0x54d   : > { %v661_v54 = vpop.permute.xlu1 %660 }
 0x54e   : > { %v1136_v55 = vpop.xlane.xlu0 %1135  ;;  %v666_v56 = vadd.f32 %v661_v54, %v652_v53  ;;  %v665_v3 = vadd.f32 %v661_v54, %v651_v62 }
 0x54f   : > { %1511 = vrcp.f32 %v1136_v55 }
 0x550   : > { %v670_v57 = vmax.f32 %v666_v56, 0.0  ;;  %v669_v60 = vmax.f32 %v665_v3, 0.0 }
 0x552   : > { %v674_v58 = vpack.c.bf16 %v670_v57, %v670_v57  ;;  %v673_v61 = vpack.c.bf16 %v669_v60, %v669_v60 }
 0x554   : > { %1174 = vmatprep.mubr.bf16.mxu0 %v674_v58 }
 0x559   : > { %v1512_v59 = vpop.eup %1511 }
 0x55a   : > { %v1139_v63 = vmul.f32 %v1512_v59, %v1508_v33  ;;  %v1138_v2 = vmul.f32 %v1512_v59, %v1506_v32  ;;  %v1182_v32 = vld [vmem:[%s1963_s12] sm:$0x3] }
 0x55c   : > { %v1141_v4 = vpack.c.bf16 %v1139_v63, %v1139_v63  ;;  %v1140_v1 = vpack.c.bf16 %v1138_v2, %v1138_v2 }
 0x55e   : > { %1142 = vmatprep.subr.bf16.mxu0 %v1141_v4 }
 0x55f   : > { %1143 = vmatpush1.bf16.xpose.msra.mxu0 %v1140_v1 }
 0x566   : > { %1175 = vmatmul.mubr.bf16.vlgmr.msra.gmra.mrb[16].mxu0 %v673_v61 }
 0x582   : > { %v1035_v17 = vpop.xlane.xlu1 %1034 }
 0x583   : > { %v1036_v5 = vmul.f32 0.00390625, %v1035_v17 }
 0x584   : > { %v1043_v6 = vpop.xlane.xlu0 %1042 }
 0x585   : > { %v1045_v7 = vmul.f32 %v1036_v5, %v1036_v5  ;;  %v1044_v9 = vmul.f32 0.00390625, %v1043_v6 }
 0x587   : > { %v1046_v10 = vsub.f32 %v1044_v9, %v1045_v7 }
 0x589   : > { %v1047_v11 = vadd.f32 1e-05, %v1046_v10 }
 0x58b   : > { %1513 = vrsqrt.f32 %v1047_v11 }
 0x595   : > { %v1514_v0 = vpop.eup %1513 }
 0x596   : > { %v1049_v12 = vmul.f32 %v1514_v0, %v1028_v13 }
 0x598   : > { %1054 = vperm.xlu0 %1493, %v1049_v12   ;;  %v1050_v8 = vmul.f32 %v1049_v12, %v1036_v5 }
 0x59a   : > { %v1051_v15 = vsub.f32 %v1400_v14, %v1050_v8 }
 0x59c   : > { %1061 = vperm.xlu0 %1493, %v1051_v15  }
 0x617   : > { %v1055_v16 = vpop.permute.xlu0 %1054 }
 0x618   : > { %v1057_v18 = vmul.f32 %v1055_v16, %v1021_v39  ;;  %v1058_v19 = vmul.f32 %v1055_v16, %v1023_v41 }
 0x61b   : > { %v1062_v20 = vpop.permute.xlu0 %1061 }
 0x61c   : > { %v1064_v21 = vadd.f32 %v1062_v20, %v1057_v18  ;;  %v1065_v23 = vadd.f32 %v1062_v20, %v1058_v19 }
 0x61e   : > { %v1068_v24 = vcombine.low %v1064_v21, %v1065_v23 }
 0x620   : > { %1070 = vst [vmem:[%s504_s16] sm:$0xff] %v1068_v24 }
 0x639   : > { %v1176_v26 = vpop.f32.mrb[16].mxu0 }
 0x63a   : > { %v1183_v27 = vpack.c.bf16 %v1176_v26, %v1176_v26  ;;  %v1178_v28 = vpop.f32.mrb[17].mxu0 }
 0x63b   : > { %v1179_v29 = vpop.f32.mrb[18].mxu0 }
 0x63c   : > { %v1194_v30 = vsel %vm545_vm0, %v1183_v27, 0  ;;  %v1180_v31 = vpop.f32.mrb[19].mxu0 }
 0x63d   : > { %1440 = vmatpush3.bf16.msra.mxu1 %v1194_v30 }
 0x640   : > { %1442 = vmatmul.mubr.msk.bf16.vlgmr.msra.gmra.mrb[16].mxu1 %vm541_vm1, %v1182_v32 }
 0x641   : > { %1528 = shalt.err (!%p1525_p3)
}
 0x642   : > { %s1529_s16 = scalar_lea.hbm %s1883_s25, 128  ;;  %s1533_s1 = scalar_lea.hbm %s1965_s14, 256 }
 0x643   : > { %p1530_p4 = scmp.ne.s32.totalorder %s1883_s25, %s1529_s16  ;;  %p1534_p9 = scmp.lt.u32.totalorder %s1883_s25, %s1965_s14 }
 0x644   : > { %p1535_p10 = scmp.lt.u32.totalorder %s1533_s1, %s1529_s16  ;;  %p1537_p12 = scmp.lt.u32.totalorder %s1529_s16, %s1883_s25 }
 0x645   : > { %p1531_p7 = pnand %p1530_p4, %p1734_p5 }
 0x646   : > { %p1536_p11 = por %p1535_p10, %p1534_p9 }
 0x647   : > { %p1532_p8 = pneg %p1531_p7 }
 0x648   : > { %p1538_p13 = por %p1537_p12, %p1536_p11 }
 0x64a   : > { %p1539_p0 = pnand %p1538_p13, %p1532_p8 }
 0x64c   : > { %1542 = shalt.err (!%p1539_p0)
}
 0x64d   : > { %1445 = dma.vmem_to_hbm [thread:$0]  (%p1734_p5), %s1259_s27, 128, %s1883_s25, %s1239_s17   ;;  %v1188_v33 = vpop.permute.xlu1 %1187  ;;  %vm1236_vm5 = vcmask 60416  }
 0x64e   : > { %s1379_s0 = sshll.u32 %s1871_s26, 2  ;;  %s1408_s30 = sshll.u32 %s1717_s22, 6 }
 0x64f   : > { %s511_s23 = scalar_lea.vmem [#allocation4], %s1379_s0  ;;  %s1908_s1 = scalar_lea.hbm %s1966_s15, %s1408_s30 }
 0x650   : > { %s1271_s20 = sshll.u32 %s511_s23, 4  ;;  %s1244_s22 = scalar_lea.sflag [#allocation5], %s1871_s26  ;;  %s1910_s20 = int_to_ptr.vmem [resolvable:$true] %s1271_s20 }
 0x651   : > { %s1543_s27 = scalar_lea.vmem %s1910_s20, 64  ;;  %s1615_s25 = smov [#allocation4]  }
 0x652   : > { %p1544_p1 = scmp.ne.s32.totalorder %s1910_s20, %s1543_s27  ;;  %s1547_s17 = sshll.u32 %s1615_s25, 4  ;;  %s1548_s17 = int_to_ptr.vmem [resolvable:$false] %s1547_s17 }
 0x653   : > { %s1549_s29 = scalar_lea.vmem %s1548_s17, 128  ;;  %p1550_p4 = scmp.lt.s32.totalorder %s1910_s20, %s1548_s17 }
 0x654   : > { %p1545_p2 = pnand %p1544_p1, %p1734_p5  ;;  %p1551_p7 = scmp.lt.s32.totalorder %s1549_s29, %s1543_s27 }
 0x656   : > { %p1546_p3 = pneg %p1545_p2  ;;  %p1552_p8 = por %p1551_p7, %p1550_p4 }
 0x658   : > { %p1553_p9 = pnand %p1552_p8, %p1546_p3 }
 0x713   : > { %v1230_v22 = vpop.f32.mrb[16].mxu1 }
 0x714   : > { %v1231_v25 = vadd.f32 %v1230_v22, %v1188_v33  ;;  %v1443_v34 = vpop.f32.mrb[17].mxu1 }
 0x715   : > { %v1233_v35 = vpop.f32.mrb[18].mxu1 }
 0x716   : > { %v1444_v36 = vpop.f32.mrb[19].mxu1  ;;  %1237 = vst.msk [vmem:[%s511_s23] sm:$0xf] %vm1236_vm5, %v1231_v25 }
 0x717   : > { %1556 = shalt.err (!%p1553_p9)
}
 0x718   : > { %s1557_s26 = scalar_lea.hbm %s1908_s1, 64  ;;  %s1561_s30 = scalar_lea.hbm %s1966_s15, 128 }
 0x719   : > { %p1558_p10 = scmp.ne.s32.totalorder %s1908_s1, %s1557_s26  ;;  %p1562_p13 = scmp.lt.u32.totalorder %s1908_s1, %s1966_s15 }
 0x71a   : > { %p1563_p0 = scmp.lt.u32.totalorder %s1561_s30, %s1557_s26  ;;  %p1565_p2 = scmp.lt.u32.totalorder %s1557_s26, %s1908_s1 }
 0x71b   : > { %p1559_p11 = pnand %p1558_p10, %p1734_p5 }
 0x71c   : > { %p1564_p1 = por %p1563_p0, %p1562_p13 }
 0x71d   : > { %p1560_p12 = pneg %p1559_p11 }
 0x71e   : > { %p1566_p3 = por %p1565_p2, %p1564_p1 }
 0x720   : > { %p1567_p4 = pnand %p1566_p3, %p1560_p12 }
 0x722   : > { %1570 = shalt.err (!%p1567_p4)
}
 0x723   : > { %1446 = dma.vmem_to_hbm [thread:$0]  (%p1734_p5), %s1910_s20, 64, %s1908_s1, %s1244_s22  }
 0x724 PF: > { %p1456_p7 = scmp.ge.s32.totalorder %s1609_s21, 2  ;;  %s1283_s27 = sand.u32 1, %s1597_s18  }
 0x725   : > { %s1284_s25 = scalar_lea.sflag [#allocation3], %s1283_s27 }
 0x726   : > { %p1450_p8 = pnand %p1456_p7, %p1738_p6 }
 0x728   : > { %1588 = dma.done.wait (!%p1450_p8), %s1284_s25, 128  }
 0x729   : > { %1590 = vsyncadd (!%p1450_p8), %s1284_s25, 4294967168  ;;  %s1293_s17 = scalar_lea.sflag [#allocation5], %s1283_s27 }
 0x72a   : > { %1592 = dma.done.wait (!%p1450_p8), %s1293_s17, 64  }
 0x72b   : > { %1594 = vsyncadd (!%p1450_p8), %s1293_s17, 4294967232  ;;  %s1984_s21 = sld [smem:[#allocation9_spill]]  ;;  %s1985_s28 = sld [smem:[#allocation8_spill]] }
 0x72c   : > { %s1986_s20 = sld [smem:[#allocation10_spill]]  ;;  %s1987_s18 = smov %s1601_s19 }
 0x731   : > { %p29_p5 = scmp.ge.s32.totalorder %s1984_s21, 4   ;;  %s1988_s19 = smov %s1985_s28 }
 0x733   :  { %31 = sbr.rel (!%p29_p5) target bundleno = 9 (0x9), region = 133 }
 0x73a   :  { %1298 = vsyncpa [#allocation3], 1 }
 0x73b   :  { %1300 = vsyncpa [#allocation3 + $0x1], 1 }
 0x73c   :  { %1301 = vsyncpa [#allocation5], 1 }
 0x73d   :  { %1303 = vsyncpa [#allocation5 + $0x1], 1 }

</bundles_post_ra>
